<compile_context>
chip_gen: v6e
topology: v6e:2x2x1
jax: 0.10.0
libtpu: 0.0.40
codegen_flags: <defaults>
</compile_context>

<pallas_src>
import math
from functools import partial

import jax
import jax.numpy as jnp
from jax.experimental import pallas as pl
from jax.experimental.pallas import tpu as pltpu


# ---------------------------------------------------------------------------
# Kernel
# ---------------------------------------------------------------------------
def _attention_layer_kernel(q_ref, k_ref, v_ref,
                            wq_ref, bq_ref,
                            wk_ref, bk_ref,
                            wv_ref, bv_ref,
                            wo_ref, bo_ref,
                            out_ref,
                            q_scr, m_scr, l_scr, ctx_scr, acc_ref,
                            *, scale):
    h = pl.program_id(1)
    kv = pl.program_id(2)
    n_heads = pl.num_programs(1)
    n_kv = pl.num_programs(2)

    B, L, D = q_ref.shape            # batch block, query length, d_model
    _, Sb, _ = k_ref.shape           # kv tile length
    E = wq_ref.shape[-1]             # d_keys per head
    Dv = wv_ref.shape[-1]            # d_values per head
    M = out_ref.shape[-1]            # d_model (output)
    feed_dt = q_scr.dtype            # MXU feed dtype (bf16 stays bf16)

    def w(ref):
        # Resident (H, in, out) block -> leading-axis (sublane) per-head
        # slice; streamed per-head block -> whole ref.
        return ref[h] if len(ref.shape) == 3 else ref[...]

    # --- Once per (batch block, head): Q projection (scale folded in) and
    #     online-softmax state init.
    @pl.when(kv == 0)
    def _():
        q = jnp.dot(q_ref[...].reshape(B * L, D), w(wq_ref),
                    preferred_element_type=jnp.float32) + w(bq_ref)
        q_scr[...] = (q * scale).reshape(B, L, E).astype(feed_dt)
        m_scr[...] = jnp.full_like(m_scr, -jnp.inf)
        l_scr[...] = jnp.zeros_like(l_scr)
        ctx_scr[...] = jnp.zeros_like(ctx_scr)

    # --- K / V projections for this head and kv tile (plain 2-D MXU dots;
    #     per-head weight slice comes from the resident head-major tensor).
    k = jnp.dot(k_ref[...].reshape(B * Sb, D), w(wk_ref),
                preferred_element_type=jnp.float32) + w(bk_ref)
    v = jnp.dot(v_ref[...].reshape(B * Sb, D), w(wv_ref),
                preferred_element_type=jnp.float32) + w(bv_ref)
    k3 = k.reshape(B, Sb, E).astype(feed_dt)
    v3 = v.reshape(B, Sb, Dv).astype(feed_dt)

    # --- Scores (batched, last-dim contraction) + online softmax update.
    s = jnp.einsum('ble,bse->bls', q_scr[...], k3,
                   preferred_element_type=jnp.float32)           # (B, L, Sb)
    m_prev = m_scr[...]
    m_new = jnp.maximum(m_prev, jnp.max(s, axis=-1, keepdims=True))
    alpha = jnp.exp(m_prev - m_new)
    p = jnp.exp(s - m_new)
    l_scr[...] = alpha * l_scr[...] + jnp.sum(p, axis=-1, keepdims=True)
    ctx_scr[...] = alpha * ctx_scr[...] + jnp.einsum(
        'bls,bsd->bld', p.astype(feed_dt), v3,
        preferred_element_type=jnp.float32)
    m_scr[...] = m_new

    # --- Last kv tile: normalize, fused output projection, head reduction.
    @pl.when(kv == n_kv - 1)
    def _():
        denom = l_scr[...]
        inv = pl.reciprocal(denom, approx=True)
        inv = inv * (2.0 - denom * inv)            # Newton step -> ~f32 exact
        ctx = (ctx_scr[...] * inv).astype(feed_dt)
        part = jnp.dot(ctx.reshape(B * L, Dv), w(wo_ref),
                       preferred_element_type=jnp.float32).reshape(B, L, M)

        @pl.when(h == 0)
        def _():
            acc_ref[...] = part                    # direct write, no zero pass

        @pl.when(h > 0)
        def _():
            acc_ref[...] += part

        @pl.when(h == n_heads - 1)
        def _():
            out_ref[...] = (acc_ref[...] + bo_ref[...]).astype(out_ref.dtype)


# ---------------------------------------------------------------------------
# Heuristics (chip-aware sizing)
# ---------------------------------------------------------------------------
def _row_align(dtype):
    itemsize = jnp.dtype(dtype).itemsize
    if itemsize == 2:
        return 16
    if itemsize == 1:
        return 32
    return 8


def _chip_info():
    """(vmem_capacity_bytes, multi_tensorcore) with safe fallbacks."""
    vmem_cap = 64 * 1024 * 1024          # conservative default (v7x-sized)
    multi_tc = True                      # conservative: keep a parallel axis
    try:
        cap = int(pltpu.get_tpu_info().vmem_capacity_bytes)
        if 16 * 1024 * 1024 <= cap <= 512 * 1024 * 1024:
            vmem_cap = cap
    except Exception:
        pass
    try:
        kind = jax.devices()[0].device_kind.lower()
        single_tc = any(t in kind for t in
                        ("v5 lite", "v5e", "v5litepod", "v6 lite", "v6e"))
        multi_tc = not single_tc
    except Exception:
        pass
    return vmem_cap, multi_tc


def _working_set_bytes(bb, L, S_blk, d_model, d_keys, d_values, n_heads,
                       act_bytes, feed_bytes, wt_bytes):
    def r8(x):
        return ((x + 7) // 8) * 8
    weights = 2 * wt_bytes * n_heads * d_model * 2 * (d_keys + d_values)
    biases = 2 * 4 * (3 * n_heads + 1) * 8 * 128          # padded (8,128) tiles
    acts = 2 * act_bytes * bb * (L + 2 * S_blk) * d_model
    scratch = (feed_bytes * bb * L * d_keys
               + 2 * 4 * bb * r8(L) * 128                 # m, l (lane padded)
               + 4 * bb * L * d_values
               + 4 * bb * L * d_model)
    temps = (2 * 4 * bb * L * S_blk                       # scores + p
             + (4 + feed_bytes) * bb * S_blk * (d_keys + d_values)
             + 4 * bb * L * d_model)                      # head partial
    return weights + biases + acts + scratch + temps


def _pick_kv_block(S, L, budget):
    """Tile the key/value sequence only when full-S scores would not fit."""
    if 2 * 4 * L * S <= budget // 2:
        return S
    for blk in (1024, 512, 256, 128):
        if blk < S and S % blk == 0:
            return blk
    return S


def _pick_batch_block(N, L, S_blk, d_model, d_keys, d_values, n_heads,
                      act_bytes, feed_bytes, wt_bytes, budget, multi_tc,
                      row_align):
    if N <= 1 or (L % row_align) or (S_blk % row_align):
        return 1
    for bb in range(N, 0, -1):
        if N % bb:
            continue
        if multi_tc and bb > max(1, N // 2):
            continue          # keep >= 2 parallel grid steps on dual-TC chips
        if _working_set_bytes(bb, L, S_blk, d_model, d_keys, d_values,
                              n_heads, act_bytes, feed_bytes,
                              wt_bytes) <= budget:
            return bb
    return 1


# ---------------------------------------------------------------------------
# Wrapper
# ---------------------------------------------------------------------------
def attention_layer_forward(queries, keys, values, params, n_heads,
                            batch_block=None, kv_block=None):
    """queries: (N, L, d_model); keys/values: (N, S, d_model)."""
    N, L, d_model = queries.shape
    _, S, _ = keys.shape
    wq, bq, wk, bk, wv, bv, wo, bo = params
    H = n_heads
    d_keys = wq.shape[1] // H
    d_values = wv.shape[1] // H

    act_dt = queries.dtype
    # bf16 activations -> bf16 weights (f32 accumulation via
    # preferred_element_type); otherwise keep f32 weights.
    feed_dt = jnp.bfloat16 if act_dt == jnp.bfloat16 else jnp.float32
    wt_dt = jnp.bfloat16 if act_dt == jnp.bfloat16 else jnp.float32

    vmem_cap, multi_tc = _chip_info()
    budget = max(8 * 1024 * 1024, vmem_cap // 4)
    align = _row_align(act_dt)
    act_bytes = jnp.dtype(act_dt).itemsize
    feed_bytes = jnp.dtype(feed_dt).itemsize
    wt_bytes = jnp.dtype(wt_dt).itemsize

    if kv_block is None:
        kv_block = _pick_kv_block(S, L, budget)
    assert S % kv_block == 0
    if batch_block is None:
        batch_block = _pick_batch_block(N, L, kv_block, d_model, d_keys,
                                        d_values, H, act_bytes, feed_bytes,
                                        wt_bytes, budget, multi_tc, align)
    assert N % batch_block == 0
    bb = batch_block

    # Head-major (H, in, out) weights; per-head slices are taken on the
    # leading (sublane) axis inside the kernel -- never a lane slice.
    wq_h = wq.reshape(d_model, H, d_keys).transpose(1, 0, 2).astype(wt_dt)
    wk_h = wk.reshape(d_model, H, d_keys).transpose(1, 0, 2).astype(wt_dt)
    wv_h = wv.reshape(d_model, H, d_values).transpose(1, 0, 2).astype(wt_dt)
    wo_h = wo.reshape(H, d_values, d_model).astype(wt_dt)
    bq_h = bq.reshape(H, 1, d_keys).astype(jnp.float32)
    bk_h = bk.reshape(H, 1, d_keys).astype(jnp.float32)
    bv_h = bv.reshape(H, 1, d_values).astype(jnp.float32)
    bo_2 = bo.reshape(1, d_model).astype(jnp.float32)

    # Weight residency: constant block index => fetched once for the whole
    # grid, when the (possibly bf16) weight set fits comfortably.
    weight_bytes = 2 * wt_bytes * H * d_model * 2 * (d_keys + d_values)
    resident = weight_bytes <= min(16 * 1024 * 1024, vmem_cap // 4)

    grid = (N // bb, H, S // kv_block)

    def const_blk(shape):
        return pl.BlockSpec(shape, lambda nb, h, kv: (0,) * len(shape))

    if resident:
        wq_spec = const_blk((H, d_model, d_keys))
        wk_spec = const_blk((H, d_model, d_keys))
        wv_spec = const_blk((H, d_model, d_values))
        wo_spec = const_blk((H, d_values, d_model))
    else:
        wq_spec = pl.BlockSpec((None, d_model, d_keys),
                               lambda nb, h, kv: (h, 0, 0))
        wk_spec = pl.BlockSpec((None, d_model, d_keys),
                               lambda nb, h, kv: (h, 0, 0))
        wv_spec = pl.BlockSpec((None, d_model, d_values),
                               lambda nb, h, kv: (h, 0, 0))
        wo_spec = pl.BlockSpec((None, d_values, d_model),
                               lambda nb, h, kv: (h, 0, 0))

    in_specs = [
        pl.BlockSpec((bb, L, d_model), lambda nb, h, kv: (nb, 0, 0)),        # q
        pl.BlockSpec((bb, kv_block, d_model), lambda nb, h, kv: (nb, kv, 0)),  # k
        pl.BlockSpec((bb, kv_block, d_model), lambda nb, h, kv: (nb, kv, 0)),  # v
        wq_spec, const_blk((H, 1, d_keys)),
        wk_spec, const_blk((H, 1, d_keys)),
        wv_spec, const_blk((H, 1, d_values)),
        wo_spec,
        const_blk((1, d_model)),                                             # bo
    ]

    est = _working_set_bytes(bb, L, kv_block, d_model, d_keys, d_values, H,
                             act_bytes, feed_bytes, wt_bytes)
    vmem_limit = int(max(32 * 1024 * 1024,
                         min(int(0.8 * vmem_cap), 2 * est)))

    kernel = partial(_attention_layer_kernel, scale=1.0 / math.sqrt(d_keys))

    return pl.pallas_call(
        kernel,
        out_shape=jax.ShapeDtypeStruct((N, L, d_model), act_dt),
        grid_spec=pltpu.PrefetchScalarGridSpec(
            num_scalar_prefetch=0,
            grid=grid,
            in_specs=in_specs,
            out_specs=pl.BlockSpec((bb, L, d_model),
                                   lambda nb, h, kv: (nb, 0, 0)),
            scratch_shapes=[
                pltpu.VMEM((bb, L, d_keys), feed_dt),        # scaled Q
                pltpu.VMEM((bb, L, 1), jnp.float32),         # running max
                pltpu.VMEM((bb, L, 1), jnp.float32),         # running denom
                pltpu.VMEM((bb, L, d_values), jnp.float32),  # running context
                pltpu.VMEM((bb, L, d_model), jnp.float32),   # head-sum acc
            ],
        ),
        compiler_params=pltpu.CompilerParams(
            dimension_semantics=("parallel", "arbitrary", "arbitrary"),
            vmem_limit_bytes=vmem_limit,
        ),
    )(queries, keys, values,
      wq_h, bq_h, wk_h, bk_h, wv_h, bv_h, wo_h, bo_2)


# ---------------------------------------------------------------------------
# Pure-JAX reference (PyTorch AttentionLayer with FullAttention)
# ---------------------------------------------------------------------------
def _reference_forward(queries, keys, values, params, n_heads):
    wq, bq, wk, bk, wv, bv, wo, bo = params
    N, L, _ = queries.shape
    _, S, _ = keys.shape
    H = n_heads
    q = (queries @ wq + bq).reshape(N, L, H, -1)
    k = (keys @ wk + bk).reshape(N, S, H, -1)
    v = (values @ wv + bv).reshape(N, S, H, -1)
    E = q.shape[-1]
    scores = jnp.einsum("blhe,bshe->bhls", q, k) / math.sqrt(E)
    attn = jax.nn.softmax(scores, axis=-1)
    new_values = jnp.einsum("bhls,bshd->blhd", attn, v).reshape(N, L, -1)
    return new_values @ wo + bo


if __name__ == "__main__":
    # Small, module-consistent shapes
    N, L, S = 2, 8, 12
    d_model, n_heads = 32, 4
    d_keys = d_model // n_heads
    d_values = d_model // n_heads

    key = jax.random.PRNGKey(0)
    ks = jax.random.split(key, 11)

    def linear_params(kw, kb, fan_in, fan_out):
        # deterministic init, PyTorch-Linear-like scale; stored as (in, out)
        bound = 1.0 / math.sqrt(fan_in)
        w = jax.random.uniform(kw, (fan_in, fan_out), jnp.float32, -bound, bound)
        b = jax.random.uniform(kb, (fan_out,), jnp.float32, -bound, bound)
        return w, b

    wq, bq = linear_params(ks[0], ks[1], d_model, d_keys * n_heads)
    wk, bk = linear_params(ks[2], ks[3], d_model, d_keys * n_heads)
    wv, bv = linear_params(ks[4], ks[5], d_model, d_values * n_heads)
    wo, bo = linear_params(ks[6], ks[7], d_values * n_heads, d_model)
    params = (wq, bq, wk, bk, wv, bv, wo, bo)

    queries = jax.random.normal(ks[8], (N, L, d_model), jnp.float32)
    keys_in = jax.random.normal(ks[9], (N, S, d_model), jnp.float32)
    values_in = jax.random.normal(ks[10], (N, S, d_model), jnp.float32)

    out = attention_layer_forward(queries, keys_in, values_in, params, n_heads)
    out = jax.block_until_ready(out)

    ref = _reference_forward(queries, keys_in, values_in, params, n_heads)
    assert out.shape == (N, L, d_model)
    # NOTE: for bf16 inputs the kernel feeds the MXU in bf16 (f32 accumulation),
    # so the tolerance should be loosened accordingly; demo inputs are f32.
    assert jnp.allclose(out, ref, atol=1e-4, rtol=1e-4), "mismatch vs reference"

    print("KERNEL_OK")
</pallas_src>

<mosaic_0001>
module attributes {stable_mosaic.version = 11 : i64} {
  func.func @_attention_layer_kernel(%arg0: i32, %arg1: i32, %arg2: i32, %arg3: memref<1x8x32xf32, #tpu.memory_space<vmem>>, %arg4: memref<1x12x32xf32, #tpu.memory_space<vmem>>, %arg5: memref<1x12x32xf32, #tpu.memory_space<vmem>>, %arg6: memref<4x32x8xf32, #tpu.memory_space<vmem>>, %arg7: memref<4x1x8xf32, #tpu.memory_space<vmem>>, %arg8: memref<4x32x8xf32, #tpu.memory_space<vmem>>, %arg9: memref<4x1x8xf32, #tpu.memory_space<vmem>>, %arg10: memref<4x32x8xf32, #tpu.memory_space<vmem>>, %arg11: memref<4x1x8xf32, #tpu.memory_space<vmem>>, %arg12: memref<4x8x32xf32, #tpu.memory_space<vmem>>, %arg13: memref<1x32xf32, #tpu.memory_space<vmem>>, %arg14: memref<1x8x32xf32, #tpu.memory_space<vmem>>, %arg15: memref<1x8x8xf32, #tpu.memory_space<vmem>>, %arg16: memref<1x8x1xf32, #tpu.memory_space<vmem>>, %arg17: memref<1x8x1xf32, #tpu.memory_space<vmem>>, %arg18: memref<1x8x8xf32, #tpu.memory_space<vmem>>, %arg19: memref<1x8x32xf32, #tpu.memory_space<vmem>>) attributes {dimension_semantics = [#tpu.dimension_semantics<parallel>, #tpu.dimension_semantics<arbitrary>, #tpu.dimension_semantics<arbitrary>], iteration_bounds = array<i64: 2, 4, 1>, scalar_prefetch = 0 : i64, scratch_operands = 5 : i64, tpu.core_type = #tpu.core_type<tc>, window_params = [{transform_indices = @transform_0, window_bounds = array<i64: 1, 8, 32>}, {transform_indices = @transform_1, window_bounds = array<i64: 1, 12, 32>}, {transform_indices = @transform_2, window_bounds = array<i64: 1, 12, 32>}, {pipeline_mode = #tpu.pipeline_mode<synchronous>, transform_indices = @transform_3, window_bounds = array<i64: 4, 32, 8>}, {pipeline_mode = #tpu.pipeline_mode<synchronous>, transform_indices = @transform_4, window_bounds = array<i64: 4, 1, 8>}, {pipeline_mode = #tpu.pipeline_mode<synchronous>, transform_indices = @transform_5, window_bounds = array<i64: 4, 32, 8>}, {pipeline_mode = #tpu.pipeline_mode<synchronous>, transform_indices = @transform_6, window_bounds = array<i64: 4, 1, 8>}, {pipeline_mode = #tpu.pipeline_mode<synchronous>, transform_indices = @transform_7, window_bounds = array<i64: 4, 32, 8>}, {pipeline_mode = #tpu.pipeline_mode<synchronous>, transform_indices = @transform_8, window_bounds = array<i64: 4, 1, 8>}, {pipeline_mode = #tpu.pipeline_mode<synchronous>, transform_indices = @transform_9, window_bounds = array<i64: 4, 8, 32>}, {pipeline_mode = #tpu.pipeline_mode<synchronous>, transform_indices = @transform_10, window_bounds = array<i64: 1, 32>}, {transform_indices = @transform_11, window_bounds = array<i64: 1, 8, 32>}]} {
    %c0_i32 = arith.constant 0 : i32
    %0 = arith.cmpi eq, %arg2, %c0_i32 : i32
    %1 = arith.extui %0 : i1 to i32
    %c0_i32_0 = arith.constant 0 : i32
    %2 = arith.cmpi ne, %1, %c0_i32_0 : i32
    scf.if %2 {
      %c0_42 = arith.constant 0 : index
      %c0_43 = arith.constant 0 : index
      %c0_44 = arith.constant 0 : index
      %54 = vector.load %arg3[%c0_42, %c0_43, %c0_44] : memref<1x8x32xf32, #tpu.memory_space<vmem>>, vector<1x8x32xf32>
      %55 = vector.shape_cast %54 : vector<1x8x32xf32> to vector<8x32xf32>
      %56 = arith.index_cast %arg1 : i32 to index
      %c0_45 = arith.constant 0 : index
      %c0_46 = arith.constant 0 : index
      %57 = vector.load %arg6[%56, %c0_45, %c0_46] : memref<4x32x8xf32, #tpu.memory_space<vmem>>, vector<1x32x8xf32>
      %58 = vector.shape_cast %57 : vector<1x32x8xf32> to vector<32x8xf32>
      %cst_47 = arith.constant dense<0.000000e+00> : vector<8x8xf32>
      %59 = tpu.matmul %55, %58, %cst_47 {dimension_numbers = #tpu.dot_dimension_numbers<[1], [0], [0], [1], [0, 0, 1, 1], [], []>} : vector<8x32xf32>, vector<32x8xf32>, vector<8x8xf32> -> vector<8x8xf32>
      %60 = arith.index_cast %arg1 : i32 to index
      %c0_48 = arith.constant 0 : index
      %c0_49 = arith.constant 0 : index
      %61 = vector.load %arg7[%60, %c0_48, %c0_49] : memref<4x1x8xf32, #tpu.memory_space<vmem>>, vector<1x1x8xf32>
      %62 = vector.shape_cast %61 : vector<1x1x8xf32> to vector<1x8xf32>
      %63 = vector.broadcast %62 : vector<1x8xf32> to vector<8x8xf32>
      %64 = arith.addf %59, %63 : vector<8x8xf32>
      %cst_50 = arith.constant 0.353553385 : f32
      %65 = vector.broadcast %cst_50 : f32 to vector<8x8xf32>
      %66 = arith.mulf %64, %65 : vector<8x8xf32>
      %67 = vector.shape_cast %66 : vector<8x8xf32> to vector<1x8x8xf32>
      %c0_51 = arith.constant 0 : index
      %c0_52 = arith.constant 0 : index
      %c0_53 = arith.constant 0 : index
      %68 = vector.load %arg15[%c0_51, %c0_52, %c0_53] : memref<1x8x8xf32, #tpu.memory_space<vmem>>, vector<1x8x8xf32>
      tpu.vector_store %arg15[%c0_51, %c0_52, %c0_53], %67 {strides = array<i32>} : memref<1x8x8xf32, #tpu.memory_space<vmem>>, vector<1x8x8xf32>,
      %cst_54 = arith.constant 0xFF800000 : f32
      %69 = vector.broadcast %cst_54 : f32 to vector<1x8x1xf32>
      %c0_55 = arith.constant 0 : index
      %c0_56 = arith.constant 0 : index
      %c0_57 = arith.constant 0 : index
      %70 = vector.load %arg16[%c0_55, %c0_56, %c0_57] : memref<1x8x1xf32, #tpu.memory_space<vmem>>, vector<1x8x1xf32>
      tpu.vector_store %arg16[%c0_55, %c0_56, %c0_57], %69 {strides = array<i32>} : memref<1x8x1xf32, #tpu.memory_space<vmem>>, vector<1x8x1xf32>,
      %cst_58 = arith.constant 0.000000e+00 : f32
      %71 = vector.broadcast %cst_58 : f32 to vector<1x8x1xf32>
      %c0_59 = arith.constant 0 : index
      %c0_60 = arith.constant 0 : index
      %c0_61 = arith.constant 0 : index
      %72 = vector.load %arg17[%c0_59, %c0_60, %c0_61] : memref<1x8x1xf32, #tpu.memory_space<vmem>>, vector<1x8x1xf32>
      tpu.vector_store %arg17[%c0_59, %c0_60, %c0_61], %71 {strides = array<i32>} : memref<1x8x1xf32, #tpu.memory_space<vmem>>, vector<1x8x1xf32>,
      %cst_62 = arith.constant 0.000000e+00 : f32
      %73 = vector.broadcast %cst_62 : f32 to vector<1x8x8xf32>
      %c0_63 = arith.constant 0 : index
      %c0_64 = arith.constant 0 : index
      %c0_65 = arith.constant 0 : index
      %74 = vector.load %arg18[%c0_63, %c0_64, %c0_65] : memref<1x8x8xf32, #tpu.memory_space<vmem>>, vector<1x8x8xf32>
      tpu.vector_store %arg18[%c0_63, %c0_64, %c0_65], %73 {strides = array<i32>} : memref<1x8x8xf32, #tpu.memory_space<vmem>>, vector<1x8x8xf32>,
    } else {
    }
    %c0 = arith.constant 0 : index
    %c0_1 = arith.constant 0 : index
    %c0_2 = arith.constant 0 : index
    %3 = vector.load %arg4[%c0, %c0_1, %c0_2] : memref<1x12x32xf32, #tpu.memory_space<vmem>>, vector<1x12x32xf32>
    %4 = vector.shape_cast %3 : vector<1x12x32xf32> to vector<12x32xf32>
    %5 = arith.index_cast %arg1 : i32 to index
    %c0_3 = arith.constant 0 : index
    %c0_4 = arith.constant 0 : index
    %6 = vector.load %arg8[%5, %c0_3, %c0_4] : memref<4x32x8xf32, #tpu.memory_space<vmem>>, vector<1x32x8xf32>
    %7 = vector.shape_cast %6 : vector<1x32x8xf32> to vector<32x8xf32>
    %cst = arith.constant dense<0.000000e+00> : vector<12x8xf32>
    %8 = tpu.matmul %4, %7, %cst {dimension_numbers = #tpu.dot_dimension_numbers<[1], [0], [0], [1], [0, 0, 1, 1], [], []>} : vector<12x32xf32>, vector<32x8xf32>, vector<12x8xf32> -> vector<12x8xf32>
    %9 = arith.index_cast %arg1 : i32 to index
    %c0_5 = arith.constant 0 : index
    %c0_6 = arith.constant 0 : index
    %10 = vector.load %arg9[%9, %c0_5, %c0_6] : memref<4x1x8xf32, #tpu.memory_space<vmem>>, vector<1x1x8xf32>
    %11 = vector.shape_cast %10 : vector<1x1x8xf32> to vector<1x8xf32>
    %12 = vector.broadcast %11 : vector<1x8xf32> to vector<12x8xf32>
    %13 = arith.addf %8, %12 : vector<12x8xf32>
    %c0_7 = arith.constant 0 : index
    %c0_8 = arith.constant 0 : index
    %c0_9 = arith.constant 0 : index
    %14 = vector.load %arg5[%c0_7, %c0_8, %c0_9] : memref<1x12x32xf32, #tpu.memory_space<vmem>>, vector<1x12x32xf32>
    %15 = vector.shape_cast %14 : vector<1x12x32xf32> to vector<12x32xf32>
    %16 = arith.index_cast %arg1 : i32 to index
    %c0_10 = arith.constant 0 : index
    %c0_11 = arith.constant 0 : index
    %17 = vector.load %arg10[%16, %c0_10, %c0_11] : memref<4x32x8xf32, #tpu.memory_space<vmem>>, vector<1x32x8xf32>
    %18 = vector.shape_cast %17 : vector<1x32x8xf32> to vector<32x8xf32>
    %cst_12 = arith.constant dense<0.000000e+00> : vector<12x8xf32>
    %19 = tpu.matmul %15, %18, %cst_12 {dimension_numbers = #tpu.dot_dimension_numbers<[1], [0], [0], [1], [0, 0, 1, 1], [], []>} : vector<12x32xf32>, vector<32x8xf32>, vector<12x8xf32> -> vector<12x8xf32>
    %20 = arith.index_cast %arg1 : i32 to index
    %c0_13 = arith.constant 0 : index
    %c0_14 = arith.constant 0 : index
    %21 = vector.load %arg11[%20, %c0_13, %c0_14] : memref<4x1x8xf32, #tpu.memory_space<vmem>>, vector<1x1x8xf32>
    %22 = vector.shape_cast %21 : vector<1x1x8xf32> to vector<1x8xf32>
    %23 = vector.broadcast %22 : vector<1x8xf32> to vector<12x8xf32>
    %24 = arith.addf %19, %23 : vector<12x8xf32>
    %25 = vector.shape_cast %13 : vector<12x8xf32> to vector<1x12x8xf32>
    %26 = vector.shape_cast %24 : vector<12x8xf32> to vector<1x12x8xf32>
    %c0_15 = arith.constant 0 : index
    %c0_16 = arith.constant 0 : index
    %c0_17 = arith.constant 0 : index
    %27 = vector.load %arg15[%c0_15, %c0_16, %c0_17] : memref<1x8x8xf32, #tpu.memory_space<vmem>>, vector<1x8x8xf32>
    "tpu.trace_start"() <{level = 10 : i32, message = "ble,bse->bls"}> : () -> ()
    %cst_18 = arith.constant dense<0.000000e+00> : vector<1x8x12xf32>
    %28 = tpu.matmul %27, %25, %cst_18 {dimension_numbers = #tpu.dot_dimension_numbers<[2], [2], [1], [1], [0, 0, 0, 1, 1, 1], [0], [0]>} : vector<1x8x8xf32>, vector<1x12x8xf32>, vector<1x8x12xf32> -> vector<1x8x12xf32>
    "tpu.trace_stop"() : () -> ()
    %c0_19 = arith.constant 0 : index
    %c0_20 = arith.constant 0 : index
    %c0_21 = arith.constant 0 : index
    %29 = vector.load %arg16[%c0_19, %c0_20, %c0_21] : memref<1x8x1xf32, #tpu.memory_space<vmem>>, vector<1x8x1xf32>
    %cst_22 = arith.constant dense<0xFF800000> : vector<1x8xf32>
    %30 = vector.multi_reduction <maximumf>, %28, %cst_22 [2] : vector<1x8x12xf32> to vector<1x8xf32>
    %31 = vector.shape_cast %30 : vector<1x8xf32> to vector<1x8x1xf32>
    %32 = arith.maximumf %29, %31 : vector<1x8x1xf32>
    %33 = arith.subf %29, %32 : vector<1x8x1xf32>
    %34 = math.exp %33 : vector<1x8x1xf32>
    %35 = vector.broadcast %32 : vector<1x8x1xf32> to vector<1x8x12xf32>
    %36 = arith.subf %28, %35 : vector<1x8x12xf32>
    %37 = math.exp %36 : vector<1x8x12xf32>
    %c0_23 = arith.constant 0 : index
    %c0_24 = arith.constant 0 : index
    %c0_25 = arith.constant 0 : index
    %38 = vector.load %arg17[%c0_23, %c0_24, %c0_25] : memref<1x8x1xf32, #tpu.memory_space<vmem>>, vector<1x8x1xf32>
    %39 = arith.mulf %34, %38 : vector<1x8x1xf32>
    %cst_26 = arith.constant dense<0.000000e+00> : vector<1x8xf32>
    %40 = vector.multi_reduction <add>, %37, %cst_26 [2] : vector<1x8x12xf32> to vector<1x8xf32>
    %41 = vector.shape_cast %40 : vector<1x8xf32> to vector<1x8x1xf32>
    %42 = arith.addf %39, %41 : vector<1x8x1xf32>
    %c0_27 = arith.constant 0 : index
    %c0_28 = arith.constant 0 : index
    %c0_29 = arith.constant 0 : index
    %43 = vector.load %arg17[%c0_27, %c0_28, %c0_29] : memref<1x8x1xf32, #tpu.memory_space<vmem>>, vector<1x8x1xf32>
    tpu.vector_store %arg17[%c0_27, %c0_28, %c0_29], %42 {strides = array<i32>} : memref<1x8x1xf32, #tpu.memory_space<vmem>>, vector<1x8x1xf32>,
    %c0_30 = arith.constant 0 : index
    %c0_31 = arith.constant 0 : index
    %c0_32 = arith.constant 0 : index
    %44 = vector.load %arg18[%c0_30, %c0_31, %c0_32] : memref<1x8x8xf32, #tpu.memory_space<vmem>>, vector<1x8x8xf32>
    %45 = vector.broadcast %34 : vector<1x8x1xf32> to vector<1x8x8xf32>
    %46 = arith.mulf %45, %44 : vector<1x8x8xf32>
    "tpu.trace_start"() <{level = 10 : i32, message = "bls,bsd->bld"}> : () -> ()
    %cst_33 = arith.constant dense<0.000000e+00> : vector<1x8x8xf32>
    %47 = tpu.matmul %37, %26, %cst_33 {dimension_numbers = #tpu.dot_dimension_numbers<[2], [1], [1], [2], [0, 0, 0, 1, 1, 2], [0], [0]>} : vector<1x8x12xf32>, vector<1x12x8xf32>, vector<1x8x8xf32> -> vector<1x8x8xf32>
    "tpu.trace_stop"() : () -> ()
    %48 = arith.addf %46, %47 : vector<1x8x8xf32>
    %c0_34 = arith.constant 0 : index
    %c0_35 = arith.constant 0 : index
    %c0_36 = arith.constant 0 : index
    %49 = vector.load %arg18[%c0_34, %c0_35, %c0_36] : memref<1x8x8xf32, #tpu.memory_space<vmem>>, vector<1x8x8xf32>
    tpu.vector_store %arg18[%c0_34, %c0_35, %c0_36], %48 {strides = array<i32>} : memref<1x8x8xf32, #tpu.memory_space<vmem>>, vector<1x8x8xf32>,
    %c0_37 = arith.constant 0 : index
    %c0_38 = arith.constant 0 : index
    %c0_39 = arith.constant 0 : index
    %50 = vector.load %arg16[%c0_37, %c0_38, %c0_39] : memref<1x8x1xf32, #tpu.memory_space<vmem>>, vector<1x8x1xf32>
    tpu.vector_store %arg16[%c0_37, %c0_38, %c0_39], %32 {strides = array<i32>} : memref<1x8x1xf32, #tpu.memory_space<vmem>>, vector<1x8x1xf32>,
    %c0_i32_40 = arith.constant 0 : i32
    %51 = arith.cmpi eq, %arg2, %c0_i32_40 : i32
    %52 = arith.extui %51 : i1 to i32
    %c0_i32_41 = arith.constant 0 : i32
    %53 = arith.cmpi ne, %52, %c0_i32_41 : i32
    scf.if %53 {
      %c0_42 = arith.constant 0 : index
      %c0_43 = arith.constant 0 : index
      %c0_44 = arith.constant 0 : index
      %54 = vector.load %arg17[%c0_42, %c0_43, %c0_44] : memref<1x8x1xf32, #tpu.memory_space<vmem>>, vector<1x8x1xf32>
      %55 = tpu.reciprocal %54 {approx = true} : vector<1x8x1xf32> -> vector<1x8x1xf32>
      %56 = arith.mulf %54, %55 : vector<1x8x1xf32>
      %cst_45 = arith.constant 2.000000e+00 : f32
      %57 = vector.broadcast %cst_45 : f32 to vector<1x8x1xf32>
      %58 = arith.subf %57, %56 : vector<1x8x1xf32>
      %59 = arith.mulf %55, %58 : vector<1x8x1xf32>
      %c0_46 = arith.constant 0 : index
      %c0_47 = arith.constant 0 : index
      %c0_48 = arith.constant 0 : index
      %60 = vector.load %arg18[%c0_46, %c0_47, %c0_48] : memref<1x8x8xf32, #tpu.memory_space<vmem>>, vector<1x8x8xf32>
      %61 = vector.broadcast %59 : vector<1x8x1xf32> to vector<1x8x8xf32>
      %62 = arith.mulf %60, %61 : vector<1x8x8xf32>
      %63 = vector.shape_cast %62 : vector<1x8x8xf32> to vector<8x8xf32>
      %64 = arith.index_cast %arg1 : i32 to index
      %c0_49 = arith.constant 0 : index
      %c0_50 = arith.constant 0 : index
      %65 = vector.load %arg12[%64, %c0_49, %c0_50] : memref<4x8x32xf32, #tpu.memory_space<vmem>>, vector<1x8x32xf32>
      %66 = vector.shape_cast %65 : vector<1x8x32xf32> to vector<8x32xf32>
      %cst_51 = arith.constant dense<0.000000e+00> : vector<8x32xf32>
      %67 = tpu.matmul %63, %66, %cst_51 {dimension_numbers = #tpu.dot_dimension_numbers<[1], [0], [0], [1], [0, 0, 1, 1], [], []>} : vector<8x8xf32>, vector<8x32xf32>, vector<8x32xf32> -> vector<8x32xf32>
      %68 = vector.shape_cast %67 : vector<8x32xf32> to vector<1x8x32xf32>
      %c0_i32_52 = arith.constant 0 : i32
      %69 = arith.cmpi eq, %arg1, %c0_i32_52 : i32
      %70 = arith.extui %69 : i1 to i32
      %c0_i32_53 = arith.constant 0 : i32
      %71 = arith.cmpi ne, %70, %c0_i32_53 : i32
      scf.if %71 {
        %c0_57 = arith.constant 0 : index
        %c0_58 = arith.constant 0 : index
        %c0_59 = arith.constant 0 : index
        %78 = vector.load %arg19[%c0_57, %c0_58, %c0_59] : memref<1x8x32xf32, #tpu.memory_space<vmem>>, vector<1x8x32xf32>
        tpu.vector_store %arg19[%c0_57, %c0_58, %c0_59], %68 {strides = array<i32>} : memref<1x8x32xf32, #tpu.memory_space<vmem>>, vector<1x8x32xf32>,
      } else {
      }
      %c0_i32_54 = arith.constant 0 : i32
      %72 = arith.cmpi sgt, %arg1, %c0_i32_54 : i32
      %73 = arith.extui %72 : i1 to i32
      %c0_i32_55 = arith.constant 0 : i32
      %74 = arith.cmpi ne, %73, %c0_i32_55 : i32
      scf.if %74 {
        %c0_57 = arith.constant 0 : index
        %c0_58 = arith.constant 0 : index
        %c0_59 = arith.constant 0 : index
        %78 = vector.load %arg19[%c0_57, %c0_58, %c0_59] : memref<1x8x32xf32, #tpu.memory_space<vmem>>, vector<1x8x32xf32>
        %79 = arith.addf %78, %68 : vector<1x8x32xf32>
        %c0_60 = arith.constant 0 : index
        %c0_61 = arith.constant 0 : index
        %c0_62 = arith.constant 0 : index
        %80 = vector.load %arg19[%c0_60, %c0_61, %c0_62] : memref<1x8x32xf32, #tpu.memory_space<vmem>>, vector<1x8x32xf32>
        tpu.vector_store %arg19[%c0_60, %c0_61, %c0_62], %79 {strides = array<i32>} : memref<1x8x32xf32, #tpu.memory_space<vmem>>, vector<1x8x32xf32>,
      } else {
      }
      %c3_i32 = arith.constant 3 : i32
      %75 = arith.cmpi eq, %arg1, %c3_i32 : i32
      %76 = arith.extui %75 : i1 to i32
      %c0_i32_56 = arith.constant 0 : i32
      %77 = arith.cmpi ne, %76, %c0_i32_56 : i32
      scf.if %77 {
        %c0_57 = arith.constant 0 : index
        %c0_58 = arith.constant 0 : index
        %c0_59 = arith.constant 0 : index
        %78 = vector.load %arg19[%c0_57, %c0_58, %c0_59] : memref<1x8x32xf32, #tpu.memory_space<vmem>>, vector<1x8x32xf32>
        %c0_60 = arith.constant 0 : index
        %c0_61 = arith.constant 0 : index
        %79 = vector.load %arg13[%c0_60, %c0_61] : memref<1x32xf32, #tpu.memory_space<vmem>>, vector<1x32xf32>
        %80 = vector.shape_cast %79 : vector<1x32xf32> to vector<1x1x32xf32>
        %81 = vector.broadcast %80 : vector<1x1x32xf32> to vector<1x8x32xf32>
        %82 = arith.addf %78, %81 : vector<1x8x32xf32>
        %c0_62 = arith.constant 0 : index
        %c0_63 = arith.constant 0 : index
        %c0_64 = arith.constant 0 : index
        %83 = vector.load %arg14[%c0_62, %c0_63, %c0_64] : memref<1x8x32xf32, #tpu.memory_space<vmem>>, vector<1x8x32xf32>
        tpu.vector_store %arg14[%c0_62, %c0_63, %c0_64], %82 {strides = array<i32>} : memref<1x8x32xf32, #tpu.memory_space<vmem>>, vector<1x8x32xf32>,
      } else {
      }
    } else {
    }
    return
  }
  func.func @transform_0(%arg0: i32, %arg1: i32, %arg2: i32) -> (i32, i32, i32) {
    %c0_i32 = arith.constant 0 : i32
    %c0_i32_0 = arith.constant 0 : i32
    %c0_i32_1 = arith.constant 0 : i32
    return %arg0, %c0_i32, %c0_i32_0 : i32, i32, i32
  }
  func.func @transform_1(%arg0: i32, %arg1: i32, %arg2: i32) -> (i32, i32, i32) {
    %c0_i32 = arith.constant 0 : i32
    %c0_i32_0 = arith.constant 0 : i32
    return %arg0, %arg2, %c0_i32 : i32, i32, i32
  }
  func.func @transform_2(%arg0: i32, %arg1: i32, %arg2: i32) -> (i32, i32, i32) {
    %c0_i32 = arith.constant 0 : i32
    %c0_i32_0 = arith.constant 0 : i32
    return %arg0, %arg2, %c0_i32 : i32, i32, i32
  }
  func.func @transform_3(%arg0: i32, %arg1: i32, %arg2: i32) -> (i32, i32, i32) {
    %c0_i32 = arith.constant 0 : i32
    %c0_i32_0 = arith.constant 0 : i32
    %c0_i32_1 = arith.constant 0 : i32
    %c0_i32_2 = arith.constant 0 : i32
    return %c0_i32, %c0_i32_0, %c0_i32_1 : i32, i32, i32
  }
  func.func @transform_4(%arg0: i32, %arg1: i32, %arg2: i32) -> (i32, i32, i32) {
    %c0_i32 = arith.constant 0 : i32
    %c0_i32_0 = arith.constant 0 : i32
    %c0_i32_1 = arith.constant 0 : i32
    %c0_i32_2 = arith.constant 0 : i32
    return %c0_i32, %c0_i32_0, %c0_i32_1 : i32, i32, i32
  }
  func.func @transform_5(%arg0: i32, %arg1: i32, %arg2: i32) -> (i32, i32, i32) {
    %c0_i32 = arith.constant 0 : i32
    %c0_i32_0 = arith.constant 0 : i32
    %c0_i32_1 = arith.constant 0 : i32
    %c0_i32_2 = arith.constant 0 : i32
    return %c0_i32, %c0_i32_0, %c0_i32_1 : i32, i32, i32
  }
  func.func @transform_6(%arg0: i32, %arg1: i32, %arg2: i32) -> (i32, i32, i32) {
    %c0_i32 = arith.constant 0 : i32
    %c0_i32_0 = arith.constant 0 : i32
    %c0_i32_1 = arith.constant 0 : i32
    %c0_i32_2 = arith.constant 0 : i32
    return %c0_i32, %c0_i32_0, %c0_i32_1 : i32, i32, i32
  }
  func.func @transform_7(%arg0: i32, %arg1: i32, %arg2: i32) -> (i32, i32, i32) {
    %c0_i32 = arith.constant 0 : i32
    %c0_i32_0 = arith.constant 0 : i32
    %c0_i32_1 = arith.constant 0 : i32
    %c0_i32_2 = arith.constant 0 : i32
    return %c0_i32, %c0_i32_0, %c0_i32_1 : i32, i32, i32
  }
  func.func @transform_8(%arg0: i32, %arg1: i32, %arg2: i32) -> (i32, i32, i32) {
    %c0_i32 = arith.constant 0 : i32
    %c0_i32_0 = arith.constant 0 : i32
    %c0_i32_1 = arith.constant 0 : i32
    %c0_i32_2 = arith.constant 0 : i32
    return %c0_i32, %c0_i32_0, %c0_i32_1 : i32, i32, i32
  }
  func.func @transform_9(%arg0: i32, %arg1: i32, %arg2: i32) -> (i32, i32, i32) {
    %c0_i32 = arith.constant 0 : i32
    %c0_i32_0 = arith.constant 0 : i32
    %c0_i32_1 = arith.constant 0 : i32
    %c0_i32_2 = arith.constant 0 : i32
    return %c0_i32, %c0_i32_0, %c0_i32_1 : i32, i32, i32
  }
  func.func @transform_10(%arg0: i32, %arg1: i32, %arg2: i32) -> (i32, i32) {
    %c0_i32 = arith.constant 0 : i32
    %c0_i32_0 = arith.constant 0 : i32
    %c0_i32_1 = arith.constant 0 : i32
    return %c0_i32, %c0_i32_0 : i32, i32
  }
  func.func @transform_11(%arg0: i32, %arg1: i32, %arg2: i32) -> (i32, i32, i32) {
    %c0_i32 = arith.constant 0 : i32
    %c0_i32_0 = arith.constant 0 : i32
    %c0_i32_1 = arith.constant 0 : i32
    return %arg0, %c0_i32, %c0_i32_0 : i32, i32, i32
  }
}

</mosaic_0001>

<bundles_post_ra>
// kernel: tpu_custom_call.1
= control target key start
LH: loop header
LB: loop body
LE: loop exit
PB: predicated region body
PF: predicated region fallthrough
CT: control target
= control target key end

     0   :  { %s1786_s0 = inlined_call_operand.vmem [shape: f32[2,8,32], index: 0, kind: input, shape index: {}]   ;;  %s1787_s1 = inlined_call_operand.vmem [shape: f32[2,12,32], index: 1, kind: input, shape index: {}]   ;;  %s1788_s2 = inlined_call_operand.vmem [shape: f32[2,12,32], index: 2, kind: input, shape index: {}]   ;;  %s1789_s3 = inlined_call_operand.vmem [shape: f32[4,32,8], index: 3, kind: input, shape index: {}]   ;;  %s1790_s4 = inlined_call_operand.vmem [shape: f32[4,1,8], index: 4, kind: input, shape index: {}]   ;;  %s1791_s5 = inlined_call_operand.vmem [shape: f32[4,32,8], index: 5, kind: input, shape index: {}]   ;;  %s1792_s6 = inlined_call_operand.vmem [shape: f32[4,1,8], index: 6, kind: input, shape index: {}]   ;;  %s1793_s7 = inlined_call_operand.vmem [shape: f32[4,32,8], index: 7, kind: input, shape index: {}]   ;;  %s1794_s8 = inlined_call_operand.vmem [shape: f32[4,1,8], index: 8, kind: input, shape index: {}]   ;;  %s1795_s9 = inlined_call_operand.vmem [shape: f32[4,8,32], index: 9, kind: input, shape index: {}]   ;;  %s1796_s10 = inlined_call_operand.vmem [shape: f32[1,32], index: 10, kind: input, shape index: {}]   ;;  %s1797_s11 = inlined_call_operand.hbm [shape: f32[2,8,32], index: 11, kind: output, shape index: {}]  }
   0x1   :  { %1802 = sst [smem:[#allocation15_spill]] %s1789_s3 }
   0x2   :  { %1803 = sst [smem:[#allocation16_spill]] %s1791_s5 }
   0x3   :  { %16 = vsyncpa [#allocation8], 0 }
   0x4   :  { %18 = vsyncpa [#allocation8 + $0x1], 0  ;;  %s1568_s17 = smov 0   ;;  %s1570_s18 = smov 0  }
   0x5   :  { %s1572_s19 = smov 0   ;;  %s1574_s20 = smov 0  }
   0x6   :  { %s1576_s21 = smov 0   ;;  %s1578_s22 = smov 0  }
   0x7   :  { %s1580_s23 = smov 0   ;;  %s1582_s24 = smov 0  }
   0x8 LB: > { %1804 = sst [smem:[#allocation10_spill]] %s1493_s22  ;;  %s1211_s25 = sadd.s32 4294967295, %s1501_s24   ;;  %s1501_s24 = sphi %s1582_s24, %s24_s24   ;;  %s1497_s23 = sphi %s1580_s23, %s1822_s23   ;;  %s1493_s22 = sphi %s1578_s22, %s1817_s22   ;;  %s1489_s21 = sphi %s1576_s21, %s1816_s21   ;;  %s1485_s20 = sphi %s1574_s20, %s1815_s20   ;;  %s1481_s19 = sphi %s1572_s19, %s1821_s19   ;;  %s1477_s18 = sphi %s1570_s18, %s1820_s18   ;;  %s1473_s17 = sphi %s1568_s17, %s1819_s17  }
   0x9   : > { %1805 = sst [smem:[#allocation11_spill]] %s1497_s23  ;;  %s1212_s26 = sadd.s32 4294967294, %s1501_s24  }
   0xa   : > { %s39_s27 = sadd.s32 1, %s1493_s22  ;;  %s43_s28 = sadd.s32 1, %s1497_s23 }
   0xb   : > { %p41_p0 = scmp.ge.s32.totalorder %s39_s27, 4  ;;  %p310_p1 = scmp.ne.s32.totalorder %s1481_s19, %s1477_s18 }
   0xc   : > { %p311_p2 = scmp.eq.s32.totalorder %s1211_s25, 7  ;;  %p316_p4 = scmp.ne.s32.totalorder %s1477_s18, %s1473_s17 }
   0xd   : > { %s1824_s27 = smov (%p41_p0, %s39_s27), 0  ;;  %s1826_s28 = smov (!%p41_p0, %s43_s28), %s1497_s23 }
   0xe   : > { %1806 = sst [smem:[#allocation12_spill]] %s1824_s27  ;;  %p1617_p3 = por %p311_p2, %p310_p1 }
   0xf   : > { %p45_p5 = scmp.ge.s32.totalorder %s1826_s28, 2  ;;  %p317_p6 = scmp.eq.s32.totalorder %s1212_s26, 7 }
  0x10   : > { %p1215_p7 = scmp.ge.s32.totalorder %s1501_s24, 1  ;;  %p392_p8 = scmp.lt.s32.totalorder %s1501_s24, 9 }
  0x11   : > { %s1828_s28 = smov (%p45_p5, %s1826_s28), 0  ;;  %p1627_p9 = por %p317_p6, %p316_p4 }
  0x12   : > { %1808 = sst [smem:[#allocation13_spill]] %s1828_s28  ;;  %p393_p10 = pnand %p1215_p7, %p392_p8 }
  0x13   : > { %s297_s12 = ssub.s32 %s1497_s23, %s1828_s28  ;;  %s300_s13 = sadd.s32 1, %s1481_s19 }
  0x14   : > { %p298_p11 = scmp.eq.s32.totalorder %s297_s12, 0  ;;  %396 = sbr.rel (%p393_p10) target bundleno = 1257 (0x4e9), region = 64 }
  0x15   : > { %s1800_s15 = sand.u32 (!%p393_p10), 1, %s1477_s18   ;;  %s1639_s16 = sshll.u32 (!%p393_p10), %s1485_s20, 5 }
  0x16   : > { %s1635_s14 = scalar_select %p298_p11, %s1481_s19, %s300_s13  }
  0x17   : > { %s1643_s25 = sshll.u32 (!%p393_p10), %s1800_s15, 3  ;;  %s1811_s3 = sld [smem:[#allocation15_spill]] (!%p393_p10) }
  0x18   : > { %1810 = sst [smem:[#allocation14_spill]] %s1635_s14  ;;  %p449_p12 = scmp.lt.s32.totalorder (!%p393_p10), %s1489_s21, 1 }
  0x19   : > { %v1503_v0 = vmov 0.0   ;;  %vm1504_vm0 = vmmov 0   ;;  %s1812_s5 = sld [smem:[#allocation16_spill]]  ;;  %vm492_vm1 = vcmask 261120   ;;  %vm567_vm2 = vcmask 64512   ;;  %s484_s22 = scalar_lea.vmem %s1790_s4, %s1485_s20 }
  0x1a   : > { %1274 = vmatprep.subr.mxu0 %v1503_v0  ;;  %1282 = vmatprep.mubr.msk.f32.mxu0 %vm1504_vm0, %v1503_v0  ;;  %s1659_s26 = scalar_select %p449_p12, %s1489_s21, 1  ;;  %572 = vst.msk [vmem:[#allocation5] sm:$0xff] %vm567_vm2, %v1503_v0  ;;  %v1223_v12 = vld [vmem:[%s484_s22] ss:$0 sm:$0xff]  ;;  %vm569_vm3 = vcmask 7168   ;;  %v1505_v26 = vmov -inf  }
  0x1b   : > { %s581_s15 = scalar_lea.vmem %s1792_s6, %s1485_s20  ;;  %s673_s22 = scalar_lea.vmem %s1793_s7, %s1639_s16  ;;  %570 = vst.msk [vmem:[#allocation3] sm:$0xff] %vm569_vm3, %v1505_v26  ;;  %571 = vst.msk [vmem:[#allocation4] sm:$0xff] %vm569_vm3, %v1503_v0  ;;  %vm849_vm4 = vcmask 97280   ;;  %v1506_v33 = vmov 0   ;;  %vm883_vm5 = vcmask 1043456  }
  0x1c   : > { %s1217_s27 = sshll.u32 %s1659_s26, 3  ;;  %s1247_s28 = sshll.u32 %s1659_s26, 4  ;;  %v1226_v14 = vld [vmem:[%s581_s15] ss:$0 sm:$0xff]  ;;  %v677_v24 = vld [vmem:[%s673_s22 + $0x18] sm:$0xff]  ;;  %v676_v25 = vld [vmem:[%s673_s22 + $0x10] sm:$0xff]  ;;  %1401 = vset.pattern.permute.xlu0 %v1506_v33  ;;  %1402 = vset.pattern.permute.xlu1 %v1506_v33 }
  0x1d   : > { %s479_s13 = scalar_lea.vmem %s1811_s3, %s1639_s16  ;;  %s452_s3 = scalar_lea.vmem %s1786_s0, %s1217_s27  ;;  %v675_v27 = vld [vmem:[%s673_s22 + $0x8] sm:$0xff]  ;;  %v674_v28 = vld [vmem:[%s673_s22] sm:$0xff] }
  0x1e   : > { %v483_v1 = vld [vmem:[%s479_s13 + $0x18] sm:$0xff]  ;;  %v482_v2 = vld [vmem:[%s479_s13 + $0x10] sm:$0xff]  ;;  %v481_v5 = vld [vmem:[%s479_s13 + $0x8] sm:$0xff]  ;;  %s461_s14 = scalar_lea.vmem %s1787_s1, %s1247_s28  ;;  %s471_s12 = scalar_lea.vmem %s1788_s2, %s1247_s28 }
  0x1f   : > { %s576_s23 = scalar_lea.vmem %s1812_s5, %s1639_s16  ;;  %1275 = vmatpush3.msra.mxu0 %v483_v1  ;;  %v480_v7 = vld [vmem:[%s479_s13] sm:$0xff]  ;;  %v574_v11 = vld [vmem:[%s461_s14 + $0x8] sm:$0xf]  ;;  %s678_s28 = scalar_lea.vmem %s1794_s8, %s1485_s20 }
  0x20   : > { %v580_v3 = vld [vmem:[%s576_s23 + $0x18] sm:$0xff]  ;;  %v579_v4 = vld [vmem:[%s576_s23 + $0x10] sm:$0xff]  ;;  %1276 = vmatprep.subr.mxu0 %v1503_v0  ;;  %v578_v6 = vld [vmem:[%s576_s23 + $0x8] sm:$0xff]  ;;  %s448_s27 = scalar_lea.vmem [#allocation7], %s1643_s25  ;;  %p1239_p13 = scmp.ne.s32.totalorder %s1485_s20, 0 }
  0x21   : > { %1285 = vmatprep.subr.mxu1 %v580_v3  ;;  %1277 = vmatpush3.msra.mxu0 %v482_v2  ;;  %v577_v8 = vld [vmem:[%s576_s23] sm:$0xff]  ;;  %v672_v29 = vld [vmem:[%s471_s12 + $0x8] sm:$0xf]  ;;  %s1237_s23 = sshll.u32 %s1485_s20, 3  ;;  %v873_v60 = vld [vmem:[#allocation5] sm:$0xff] }
  0x22   : > { %1286 = vmatpush3.msra.mxu1 %v580_v3  ;;  %1278 = vmatprep.subr.mxu0 %v1503_v0  ;;  %v477_v9 = vld [vmem:[%s452_s3] sm:$0xff]  ;;  %v848_v34 = vld [vmem:[#allocation3] sm:$0xff]  ;;  %s976_s13 = scalar_lea.vmem %s1795_s9, %s1237_s23  ;;  %v865_v51 = vld [vmem:[#allocation4] sm:$0xff] }
  0x23   : > { %1287 = vmatprep.subr.mxu1 %v579_v4  ;;  %1279 = vmatpush3.msra.mxu0 %v481_v5  ;;  %v573_v10 = vld [vmem:[%s461_s14] sm:$0xff] }
  0x24   : > { %1288 = vmatpush3.msra.mxu1 %v579_v4  ;;  %1280 = vmatprep.subr.mxu0 %v1503_v0  ;;  %v671_v23 = vld [vmem:[%s471_s12] sm:$0xff] }
  0x25   : > { %1289 = vmatprep.subr.mxu1 %v578_v6  ;;  %1281 = vmatpush3.msra.mxu0 %v480_v7  ;;  %v1229_v39 = vld [vmem:[%s678_s28] ss:$0 sm:$0xff] }
  0x26   : > { %1290 = vmatpush3.msra.mxu1 %v578_v6  ;;  %1283 = vmatmul.mubr.msk.f32.vlgmr.msra.gmra.mxu0 %vm492_vm1, %v477_v9  ;;  %v977_v50 = vld [vmem:[%s976_s13] sm:$0xff] }
  0x27   : > { %1291 = vmatprep.subr.mxu1 %v577_v8  ;;  %1293 = vmatprep.mubr.msk.f32.mxu1 %vm492_vm1, %v573_v10 }
  0x28   : > { %1292 = vmatpush3.msra.mxu1 %v577_v8  ;;  %1304 = vmatprep.mubr.msk.f32.mxu0 %vm492_vm1, %v671_v23 }
  0x29   : > { %1294 = vmatmul.mubr.msk.f32.vlgmr.msra.gmra.mxu1 %vm492_vm1, %v574_v11  ;;  %1307 = vmatprep.subr.mxu1 %v1503_v0 }
  0x2a   : > { %1311 = vmatprep.mubr.msk.f32.mxu1 %vm1504_vm0, %v1503_v0  ;;  %1296 = vmatprep.subr.mxu0 %v677_v24 }
  0x2b   : > { %1297 = vmatpush3.msra.mxu0 %v677_v24 }
  0x2c   : > { %1298 = vmatprep.subr.mxu0 %v676_v25 }
  0x2d   : > { %1299 = vmatpush3.msra.mxu0 %v676_v25 }
  0x2e   : > { %1300 = vmatprep.subr.mxu0 %v675_v27 }
  0x2f   : > { %1301 = vmatpush3.msra.mxu0 %v675_v27 }
  0x30   : > { %1302 = vmatprep.subr.mxu0 %v674_v28 }
  0x31   : > { %1303 = vmatpush3.msra.mxu0 %v674_v28 }
  0x32   : > { %1305 = vmatmul.mubr.msk.f32.vlgmr.msra.gmra.mxu0 %vm492_vm1, %v672_v29  ;;  %1314 = vmatprep.subr.mxu0 %v1503_v0 }
  0x33   : > { %1318 = vmatprep.mubr.msk.f32.mxu0 %vm1504_vm0, %v1503_v0 }
  0xe6   : > { %v562_v13 = vpop.f32.mrf.mxu0 }
  0xe7   : > { %v563_v15 = vadd.f32 %v1223_v12, %v562_v13 }
  0xe8   : > { %v1284_v17 = vpop.f32.mrf.mxu0 }
  0xe9   : > { %v1295_v16 = vpop.f32.mrf.mxu1  ;;  %v566_v18 = vmul.f32 0.35355338, %v563_v15 }
  0xea   : > { %v668_v19 = vadd.f32 %v1295_v16, %v1226_v14 }
  0xeb   : > { %v662_v20 = vpop.f32.mrf.mxu1  ;;  %568 = vst.msk [vmem:[#allocation2] sm:$0xff] %vm567_vm2, %v566_v18 }
  0xec   : > { %1308 = vmatpush3.xpose.msk.msra.mxu1 %vm567_vm2, %v668_v19  ;;  %v663_v21 = vadd.f32 %v1226_v14, %v662_v20 }
  0xed   : > { %1309 = vmatprep.subr.mxu1 %v1503_v0 }
  0xf0   : > { %1310 = vmatpush3.xpose.msk.msra.mxu1 %vm567_vm2, %v663_v21 }
  0xf1   : > { %1321 = vmatprep.subr.mxu1 %v1503_v0 }
  0xf2   : > { %v767_v22 = vld [vmem:[#allocation2] sm:$0xff]  ;;  %v1306_v38 = vpop.f32.mrf.mxu0 }
  0xf3   : > { %1312 = vmatmul.mubr.msk.f32.vlgmr.msra.gmra.mxu1 %vm567_vm2, %v767_v22  ;;  %v764_v40 = vadd.f32 %v1306_v38, %v1229_v39 }
  0xf4   : > { %1323 = vmatprep.mubr.msk.f32.mxu1 %vm1504_vm0, %v1503_v0  ;;  %v758_v41 = vpop.f32.mrf.mxu0  ;;  %1322 = vmatpush3.msra.mxu1 %v977_v50 }
  0xf5   : > { %v759_v42 = vadd.f32 %v1229_v39, %v758_v41  ;;  %1315 = vmatpush3.msk.msra.mxu0 %vm883_vm5, %v764_v40 }
  0xf6   : > { %1316 = vmatprep.subr.mxu0 %v1503_v0 }
  0xf7   : > { %1317 = vmatpush3.msra.mxu0 %v759_v42 }
 0x1b3   : > { %v844_v30 = vpop.f32.mrf.mxu1 }
 0x1b4   : > { %v850_v31 = vsel %vm849_vm4, %v844_v30, -inf }
 0x1b5   : > { %851 = vmax.xlane.f32.xlu0 %v850_v31  ;;  %v1313_v32 = vpop.f32.mrf.mxu1 }
 0x23e   : > { %v852_v35 = vpop.xlane.xlu0 %851 }
 0x23f   : > { %v853_v36 = vmax.f32 %v848_v34, %v852_v35 }
 0x241   : > { %v854_v37 = vsub.f32 %v848_v34, %v853_v36  ;;  %959 = vst.msk [vmem:[#allocation3] sm:$0xff] %vm569_vm3, %v853_v36  ;;  %859 = vperm.xlu0 %1401, %v853_v36  }
 0x243   : > { %v855_v47 = vmul.f32 1.442695, %v854_v37 }
 0x2bc   : > { %v860_v43 = vpop.permute.xlu0 %859 }
 0x2bd   : > { %v862_v44 = vsub.f32 %v844_v30, %v860_v43 }
 0x2bf   : > { %v863_v45 = vmul.f32 1.442695, %v862_v44 }
 0x2c1   : > { %1403 = vpow2.f32 %v863_v45 }
 0x2c2   : > { %1405 = vpow2.f32 %v855_v47 }
 0x2ce   : > { %v1404_v46 = vpop.eup %1403 }
 0x2cf   : > { %1319 = vmatmul.mubr.msk.f32.vlgmr.msra.gmra.mxu0 %vm849_vm4, %v1404_v46  ;;  %v867_v48 = vsel %vm849_vm4, %v1404_v46, 0.0  ;;  %v1406_v49 = vpop.eup %1405 }
 0x2d0   : > { %868 = vadd.xlane.f32.xlu1 %v867_v48  ;;  %v866_v52 = vmul.f32 %v1406_v49, %v865_v51 }
 0x2e1   : > { %876 = vperm.xlu1 %1402, %v1406_v49  }
 0x359   : > { %v869_v53 = vpop.xlane.xlu1 %868 }
 0x35a   : > { %v870_v54 = vadd.f32 %v869_v53, %v866_v52 }
 0x35c   : > { %872 = vst.msk [vmem:[#allocation4] sm:$0xff] %vm569_vm3, %v870_v54 }
 0x35d   : > { %v877_v61 = vpop.permute.xlu1 %876 }
 0x35e   : > { %v879_v62 = vmul.f32 %v877_v61, %v873_v60 }
 0x363   : > { %v963_v55 = vld [vmem:[#allocation4] sm:$0xff] }
 0x364   : > { %1407 = vrcp.f32 %v963_v55 }
 0x371   : > { %v1408_v56 = vpop.eup %1407 }
 0x372   : > { %v965_v57 = vmul.f32 %v1408_v56, %v963_v55 }
 0x374   : > { %v966_v58 = vsub.f32 2.0, %v965_v57 }
 0x376   : > { %v967_v59 = vmul.f32 %v1408_v56, %v966_v58 }
 0x378   : > { %971 = vperm.xlu1 %1402, %v967_v59  }
 0x38f   : > { %v953_v63 = vpop.f32.mrf.mxu0 }
 0x390   : > { %v957_v0 = vadd.f32 %v953_v63, %v879_v62 }
 0x391   : > { %v1320_v1 = vpop.f32.mrf.mxu0 }
 0x392   : > { %958 = vst.msk [vmem:[#allocation5] sm:$0xff] %vm567_vm2, %v957_v0 }
 0x399   : > { %v968_v3 = vld [vmem:[#allocation5] sm:$0xff] }
 0x3f3   : > { %v972_v2 = vpop.permute.xlu1 %971 }
 0x3f4   : > { %v974_v4 = vmul.f32 %v972_v2, %v968_v3 }
 0x3f6   : > { %1324 = vmatmul.mubr.msk.f32.vlgmr.msra.gmra.mxu1 %vm567_vm2, %v974_v4 }
 0x4b4   : > { %1054 = sbr.rel (%p1239_p13) target bundleno = 1210 (0x4ba), region = 76 }
 0x4b6   : > { %v1047_v5 = vpop.f32.mrf.mxu1 }
 0x4b8   : > { %v1325_v6 = vpop.f32.mrf.mxu1 }
 0x4b9   : > { %1055 = vst.msk [vmem:[#allocation6] sm:$0xff] %vm492_vm1, %v1047_v5 }
 0x4ba PF: > { %p1240_p0 = scmp.le.s32.totalorder %s1485_s20, 0 }
 0x4bc   : > { %1059 = sbr.rel (%p1240_p0) target bundleno = 1221 (0x4c5), region = 80 }
 0x4c1   : > { %v1060_v7 = vld [vmem:[#allocation6] sm:$0xff] }
 0x4c2   : > { %v1061_v8 = vadd.f32 %v1060_v7, %v1047_v5 }
 0x4c4   : > { %1062 = vst.msk [vmem:[#allocation6] sm:$0xff] %vm492_vm1, %v1061_v8 }
 0x4c5 PF: > { %p1241_p1 = scmp.ne.s32.totalorder %s1485_s20, 3 }
 0x4c7   : > { %1066 = sbr.rel (%p1241_p1) target bundleno = 1233 (0x4d1), region = 84 }
 0x4cc   : > { %v1067_v9 = vld [vmem:[#allocation6] sm:$0xff] }
 0x4cd   : > { %v1242_v10 = vld [vmem:[%s1796_s10] ss:$0 sm:$0xff] }
 0x4ce   : > { %v1075_v11 = vadd.f32 %v1242_v10, %v1067_v9 }
 0x4d0   : > { %1076 = vst.msk [vmem:[%s448_s27] sm:$0xff] %vm492_vm1, %v1075_v11 }
 0x4d1 PF: > { %s1244_s3 = sshll.u32 %s1489_s21, 7  ;;  %s1091_s26 = sshll.u32 %s448_s27, 4  ;;  %s1092_s26 = int_to_ptr.vmem [resolvable:$true] %s1091_s26 }
 0x4d2   : > { %s1089_s16 = scalar_lea.hbm %s1797_s11, %s1244_s3  ;;  %s1813_s20 = sand.u32 1, %s1477_s18  }
 0x4d3   : > { %s1078_s28 = scalar_lea.sflag [#allocation8], %s1813_s20  ;;  %s1409_s23 = scalar_lea.vmem %s1092_s26, 128 }
 0x4d4   : > { %p1410_p2 = scmp.ne.s32.totalorder %s1092_s26, %s1409_s23  ;;  %s1507_s14 = smov [#allocation7]  }
 0x4d5   : > { %s1413_s15 = sshll.u32 %s1507_s14, 4  ;;  %s1414_s15 = int_to_ptr.vmem [resolvable:$false] %s1413_s15 }
 0x4d6   : > { %p1411_p4 = pnand %p1410_p2, %p1617_p3  ;;  %s1415_s13 = scalar_lea.vmem %s1414_s15, 256 }
 0x4d7   : > { %p1416_p6 = scmp.lt.s32.totalorder %s1092_s26, %s1414_s15  ;;  %p1417_p7 = scmp.lt.s32.totalorder %s1415_s13, %s1409_s23 }
 0x4d8   : > { %p1412_p5 = pneg %p1411_p4 }
 0x4d9   : > { %p1418_p8 = por %p1417_p7, %p1416_p6 }
 0x4db   : > { %p1419_p10 = pnand %p1418_p8, %p1412_p5 }
 0x4dd   : > { %1422 = shalt.err (!%p1419_p10)
}
 0x4de   : > { %s1423_s21 = scalar_lea.hbm %s1089_s16, 128  ;;  %s1427_s25 = scalar_lea.hbm %s1797_s11, 256 }
 0x4df   : > { %p1424_p11 = scmp.ne.s32.totalorder %s1089_s16, %s1423_s21  ;;  %p1428_p0 = scmp.lt.s32.totalorder %s1089_s16, %s1797_s11 }
 0x4e0   : > { %p1429_p1 = scmp.lt.s32.totalorder %s1427_s25, %s1423_s21 }
 0x4e1   : > { %p1425_p12 = pnand %p1424_p11, %p1617_p3 }
 0x4e2   : > { %p1430_p2 = por %p1429_p1, %p1428_p0 }
 0x4e3   : > { %p1426_p13 = pneg %p1425_p12 }
 0x4e5   : > { %p1431_p4 = pnand %p1430_p2, %p1426_p13 }
 0x4e7   : > { %1434 = shalt.err (!%p1431_p4)
}
 0x4e8   : > { %1326 = dma.vmem_to_hbm [thread:$0]  (%p1617_p3), %s1092_s26, 128, %s1089_s16, %s1078_s28  }
 0x4e9 PF: > { %p1332_p5 = scmp.ge.s32.totalorder %s1501_s24, 2  ;;  %s1103_s22 = sand.u32 1, %s1473_s17  }
 0x4ea   : > { %s1104_s20 = scalar_lea.sflag [#allocation8], %s1103_s22 }
 0x4eb   : > { %p1329_p6 = pnand %p1332_p5, %p1627_p9 }
 0x4ed   : > { %p1330_p7 = pneg %p1329_p6 }
 0x4ef   : > { %1468 = dma.done.wait (%p1330_p7), %s1104_s20, 128  }
 0x4f0   : > { %1470 = vsyncadd (%p1330_p7), %s1104_s20, 4294967168  ;;  %s24_s24 = sadd.s32 1, %s1501_s24   ;;  %s1814_s23 = sld [smem:[#allocation14_spill]] }
 0x4f1   : > { %p21_p8 = scmp.ge.s32.totalorder %s24_s24, 10   ;;  %s1815_s20 = sld [smem:[#allocation10_spill]] }
 0x4f2   : > { %s1816_s21 = sld [smem:[#allocation11_spill]]  ;;  %s1819_s17 = smov %s1477_s18 }
 0x4f3   : > { %s1817_s22 = sld [smem:[#allocation12_spill]]  ;;  %s1820_s18 = smov %s1481_s19 }
 0x4f4   : > { %s1818_s29 = sld [smem:[#allocation13_spill]] }
 0x4f6   : > { %s1821_s19 = smov %s1814_s23  ;;  %23 = sbr.rel (!%p21_p8) target bundleno = 8 (0x8), region = 132 }
 0x4fa   : > { %s1822_s23 = smov %s1818_s29 }
 0x4fb   :  { %1109 = vsyncpa [#allocation8], 1 }
 0x4fc   :  { %1111 = vsyncpa [#allocation8 + $0x1], 1 }

</bundles_post_ra>
